<compile_context>
chip_gen: v7x
topology: tpu7x:2x2x1
jax: 0.10.0
libtpu: 0.0.40
codegen_flags: <defaults>
</compile_context>

<pallas_src>
import jax
import jax.numpy as jnp
from jax.experimental import pallas as pl
from jax.experimental.pallas import tpu as pltpu

C = 112                      # out_channels (fixed by the module: 112 concat layers)
N = 112                      # node count (== out_channels per the Conv1d contract)
NP = 128                     # node/lane axis padded to a full lane tile
IC = 16                      # in_channels (free; pick small)
B = 2                        # batch (statically unrolled in the kernel)
KAUG = ((IC + 2 + 7) // 8) * 8   # augmented contraction dim [xt|ones|ni], 8-aligned


def node_predictor_kernel(r_ref, wl_ref, wct_ref, lslab_ref, out_ref):
    # r_ref    : (KAUG, B*NP) f32   rows 0:IC  = x[b,n,k] transposed, row IC = 1,
    #                               row IC+1 = node_info[b,n]; zero-padded K rows
    #                               and zero-padded lanes (n >= 112).
    # wl_ref   : (2C, KAUG)  f32    [[W1 | b1 | 0], [0 | b0 | W0]]
    # wct_ref  : (NP, NP)    bf16   Conv1d(k=1) weight transposed, columns scaled
    #                               by wy, zero-padded to 128x128.
    # lslab_ref: (8, NP)     f32    row0 = wx, row1 = bc*wy + bcat (pad lanes 0).
    # out_ref  : (B*C, NP)   f32    out[b*C + f, i] == final_output[b*C + f, i]
    wl = wl_ref[...]
    wct = wct_ref[...]
    wx = lslab_ref[0:1, :]        # (1, NP)
    bias = lslab_ref[1:2, :]      # (1, NP)  = bc*wy + bcat

    # NOTE: pad lanes (>= 112) stay exactly zero through every step below because
    # r pad columns, wct pad rows/cols, wx and bias pad lanes are all zero.
    for b in range(B):            # B = 2, static unroll; no concat materialization
        # Augmented first matmul (f32): rows 0:C = X + b1, rows C:2C = W0*ni + b0.
        A = jnp.dot(wl, r_ref[:, b * NP:(b + 1) * NP],
                    preferred_element_type=jnp.float32)            # (2C, NP)
        Xb = A[:C, :]                                              # layers[0] + b1
        Yb = jnp.maximum(A[C:, :], 0.0)                            # relu(node_layers[0])
        # Conv1d(k=1) over the node-as-channel axis as one 128x128 MXU tile,
        # with wy pre-folded into the weight columns (bf16 operands, f32 acc).
        Zb = jnp.dot(Yb.astype(jnp.bfloat16), wct,
                     preferred_element_type=jnp.float32)           # (C, NP)
        # 112 independent Linear(2 -> 1) layers fused: wx*X + wy*(Wc@Y + bc) + bcat.
        out_ref[b * C:(b + 1) * C, :] = Xb * wx + Zb + bias


def pack_params(params):
    """One-time parameter packing (hoisted out of the per-call hot path)."""
    W1, b1, W0, b0, Wc3, bc, wcat3, bcat = params
    wx = wcat3[:, 0, 0]                                            # (C,)
    wy = wcat3[:, 0, 1]                                            # (C,)

    # Augmented LHS for the first matmul: [[W1 | b1 | 0], [0 | b0 | W0]].
    wl = jnp.zeros((2 * C, KAUG), jnp.float32)
    wl = wl.at[:C, :IC].set(W1).at[:C, IC].set(b1)
    wl = wl.at[C:, IC].set(b0).at[C:, IC + 1].set(W0[:, 0])

    # Conv1d(k=1) weight, transposed, wy folded into columns, zero-padded 128x128.
    wctp = jnp.zeros((NP, NP), jnp.float32)
    wctp = wctp.at[:N, :N].set(Wc3[:, :, 0].T * wy[None, :]).astype(jnp.bfloat16)

    # Lane slab: row0 = wx, row1 = bias' = bc*wy + bcat (pad lanes stay zero).
    lslab = jnp.zeros((8, NP), jnp.float32)
    lslab = lslab.at[0, :N].set(wx).at[1, :N].set(bc * wy + bcat)
    return wl, wctp, lslab


@jax.jit
def node_predictor(x, node_info, wl, wctp, lslab):
    """x: (B, N, IC), node_info: (B, N, 1) -> (B*C, 128) lane-padded output.

    Columns [0:112] match the PyTorch module's (B*112, 112) output; columns
    [112:128] are exactly zero (consumers that need the exact PyTorch shape can
    slice, but the kernel-side store stays lane-dense / unmasked)."""
    xt = jnp.transpose(x, (2, 0, 1)).astype(jnp.float32)           # (IC, B, N)
    ones = jnp.ones((1, B, N), jnp.float32)
    nit = jnp.transpose(node_info, (2, 0, 1)).astype(jnp.float32)  # (1, B, N)
    r = jnp.concatenate([xt, ones, nit], axis=0)                   # (IC+2, B, N)
    r = jnp.pad(r, ((0, KAUG - (IC + 2)), (0, 0), (0, NP - N)))    # (KAUG, B, NP)
    r = r.reshape(KAUG, B * NP)

    return pl.pallas_call(
        node_predictor_kernel,
        out_shape=jax.ShapeDtypeStruct((B * C, NP), jnp.float32),
        grid=(1,),                               # whole problem in VMEM, one step
        in_specs=[
            pl.BlockSpec((KAUG, B * NP), lambda i: (0, 0)),   # r  = [xt|ones|ni]
            pl.BlockSpec((2 * C, KAUG), lambda i: (0, 0)),    # wl = [[W1|b1|0],[0|b0|W0]]
            pl.BlockSpec((NP, NP), lambda i: (0, 0)),         # WcT' (wy folded)
            pl.BlockSpec((8, NP), lambda i: (0, 0)),          # [wx | bias']
        ],
        out_specs=pl.BlockSpec((B * C, NP), lambda i: (0, 0)),
        compiler_params=pltpu.CompilerParams(dimension_semantics=("arbitrary",)),
    )(r, wl, wctp, lslab)


def ref_forward(x, node_info, params):
    """Pure-JAX (f32) transcription of the PyTorch forward (for verification)."""
    W1, b1, W0, b0, Wc3, bc, wcat3, bcat = params
    X = jnp.einsum("bni,oi->bno", x, W1) + b1                           # layers[0]
    Y = jax.nn.relu(jnp.einsum("bnk,ok->bno", node_info, W0) + b0)      # node_layers[0]
    Z = jnp.einsum("oc,bcl->bol", Wc3[:, :, 0], Y) + bc[None, :, None]  # node_layers[1]
    cols = []
    for i in range(C):
        xi = X[:, i].reshape(-1, 1)
        zi = Z[:, i].reshape(-1, 1)
        cat = jnp.concatenate([xi, zi], axis=1)
        cols.append(cat @ wcat3[i].T + bcat[i])                         # concat_layers[i]
    return jnp.concatenate(cols, axis=1)


def make_params(key):
    ks = jax.random.split(key, 8)
    W1 = 0.1 * jax.random.normal(ks[0], (C, IC), jnp.float32)       # Linear(IC, C)
    b1 = 0.1 * jax.random.normal(ks[1], (C,), jnp.float32)
    W0 = 0.1 * jax.random.normal(ks[2], (C, 1), jnp.float32)        # Linear(1, C)
    b0 = 0.1 * jax.random.normal(ks[3], (C,), jnp.float32)
    Wc3 = 0.1 * jax.random.normal(ks[4], (C, C, 1), jnp.float32)    # Conv1d(C, C, k=1)
    bc = 0.1 * jax.random.normal(ks[5], (C,), jnp.float32)
    wcat3 = 0.1 * jax.random.normal(ks[6], (C, 1, 2), jnp.float32)  # 112 x Linear(2, 1)
    bcat = 0.1 * jax.random.normal(ks[7], (C,), jnp.float32)
    return (W1, b1, W0, b0, Wc3, bc, wcat3, bcat)


if __name__ == "__main__":
    key = jax.random.PRNGKey(0)
    kp, kx, kn = jax.random.split(key, 3)
    params = make_params(kp)
    x = jax.random.normal(kx, (B, N, IC), jnp.float32)
    node_info = jax.random.normal(kn, (B, N, 1), jnp.float32)

    packed = pack_params(params)                       # one-time (hoisted) packing
    out_padded = node_predictor(x, node_info, *packed)
    out_padded = jax.block_until_ready(out_padded)

    ref = ref_forward(x, node_info, params)

    assert out_padded.shape == (B * C, NP), out_padded.shape
    # Pad lanes (columns 112:128) must be exactly zero (see kernel NOTE).
    assert bool(jnp.all(out_padded[:, N:] == 0.0)), "pad lanes leaked non-zero values"

    out = out_padded[:, :N]                            # PyTorch-shaped view for checking
    assert out.shape == (B * C, N), out.shape
    # Only the 128x128 Conv1d matmul runs with bf16 MXU operands (f32 accumulation);
    # the first matmul and all elementwise work are f32, so 2e-2 is conservative.
    if not jnp.allclose(out, ref, rtol=2e-2, atol=2e-2):
        err = float(jnp.max(jnp.abs(out - ref)))
        raise AssertionError(f"Pallas kernel output mismatch, max abs err {err}")
    print("KERNEL_OK")
</pallas_src>

<mosaic_0001>
module attributes {stable_mosaic.version = 11 : i64} {
  func.func @node_predictor_kernel(%arg0: i32, %arg1: memref<24x256xf32, #tpu.memory_space<vmem>>, %arg2: memref<224x24xf32, #tpu.memory_space<vmem>>, %arg3: memref<128x128xbf16, #tpu.memory_space<vmem>>, %arg4: memref<8x128xf32, #tpu.memory_space<vmem>>, %arg5: memref<224x128xf32, #tpu.memory_space<vmem>>) attributes {dimension_semantics = [#tpu.dimension_semantics<arbitrary>], iteration_bounds = array<i64: 1>, scalar_prefetch = 0 : i64, scratch_operands = 0 : i64, tpu.core_type = #tpu.core_type<tc>, window_params = [{pipeline_mode = #tpu.pipeline_mode<synchronous>, transform_indices = @transform_0, window_bounds = array<i64: 24, 256>}, {pipeline_mode = #tpu.pipeline_mode<synchronous>, transform_indices = @transform_1, window_bounds = array<i64: 224, 24>}, {pipeline_mode = #tpu.pipeline_mode<synchronous>, transform_indices = @transform_2, window_bounds = array<i64: 128, 128>}, {pipeline_mode = #tpu.pipeline_mode<synchronous>, transform_indices = @transform_3, window_bounds = array<i64: 8, 128>}, {pipeline_mode = #tpu.pipeline_mode<synchronous>, transform_indices = @transform_4, window_bounds = array<i64: 224, 128>}]} {
    %c0 = arith.constant 0 : index
    %c0_0 = arith.constant 0 : index
    %0 = vector.load %arg2[%c0, %c0_0] : memref<224x24xf32, #tpu.memory_space<vmem>>, vector<224x24xf32>
    %c0_1 = arith.constant 0 : index
    %c0_2 = arith.constant 0 : index
    %1 = vector.load %arg3[%c0_1, %c0_2] : memref<128x128xbf16, #tpu.memory_space<vmem>>, vector<128x128xbf16>
    %c0_3 = arith.constant 0 : index
    %c0_4 = arith.constant 0 : index
    %2 = vector.load %arg4[%c0_3, %c0_4] : memref<8x128xf32, #tpu.memory_space<vmem>>, vector<1x128xf32>
    %c1 = arith.constant 1 : index
    %c0_5 = arith.constant 0 : index
    %3 = vector.load %arg4[%c1, %c0_5] : memref<8x128xf32, #tpu.memory_space<vmem>>, vector<1x128xf32>
    %c0_6 = arith.constant 0 : index
    %c0_7 = arith.constant 0 : index
    %4 = vector.load %arg1[%c0_6, %c0_7] : memref<24x256xf32, #tpu.memory_space<vmem>>, vector<24x128xf32>
    %cst = arith.constant dense<0.000000e+00> : vector<224x128xf32>
    %5 = tpu.matmul %0, %4, %cst {dimension_numbers = #tpu.dot_dimension_numbers<[1], [0], [0], [1], [0, 0, 1, 1], [], []>} : vector<224x24xf32>, vector<24x128xf32>, vector<224x128xf32> -> vector<224x128xf32>
    %6 = vector.extract_strided_slice %5 {offsets = [0, 0], sizes = [112, 128], strides = [1, 1]} : vector<224x128xf32> to vector<112x128xf32>
    %7 = vector.extract_strided_slice %5 {offsets = [112, 0], sizes = [112, 128], strides = [1, 1]} : vector<224x128xf32> to vector<112x128xf32>
    %cst_8 = arith.constant 0.000000e+00 : f32
    %8 = vector.broadcast %cst_8 : f32 to vector<112x128xf32>
    %9 = arith.maximumf %7, %8 : vector<112x128xf32>
    %10 = arith.truncf %9 : vector<112x128xf32> to vector<112x128xbf16>
    %cst_9 = arith.constant dense<0.000000e+00> : vector<112x128xf32>
    %11 = tpu.matmul %10, %1, %cst_9 {dimension_numbers = #tpu.dot_dimension_numbers<[1], [0], [0], [1], [0, 0, 1, 1], [], []>} : vector<112x128xbf16>, vector<128x128xbf16>, vector<112x128xf32> -> vector<112x128xf32>
    %12 = vector.broadcast %2 : vector<1x128xf32> to vector<112x128xf32>
    %13 = arith.mulf %6, %12 : vector<112x128xf32>
    %14 = arith.addf %13, %11 : vector<112x128xf32>
    %15 = vector.broadcast %3 : vector<1x128xf32> to vector<112x128xf32>
    %16 = arith.addf %14, %15 : vector<112x128xf32>
    %c0_10 = arith.constant 0 : index
    %c0_11 = arith.constant 0 : index
    %17 = vector.load %arg5[%c0_10, %c0_11] : memref<224x128xf32, #tpu.memory_space<vmem>>, vector<112x128xf32>
    tpu.vector_store %arg5[%c0_10, %c0_11], %16 {strides = array<i32>} : memref<224x128xf32, #tpu.memory_space<vmem>>, vector<112x128xf32>,
    %c0_12 = arith.constant 0 : index
    %c128 = arith.constant 128 : index
    %18 = vector.load %arg1[%c0_12, %c128] : memref<24x256xf32, #tpu.memory_space<vmem>>, vector<24x128xf32>
    %cst_13 = arith.constant dense<0.000000e+00> : vector<224x128xf32>
    %19 = tpu.matmul %0, %18, %cst_13 {dimension_numbers = #tpu.dot_dimension_numbers<[1], [0], [0], [1], [0, 0, 1, 1], [], []>} : vector<224x24xf32>, vector<24x128xf32>, vector<224x128xf32> -> vector<224x128xf32>
    %20 = vector.extract_strided_slice %19 {offsets = [0, 0], sizes = [112, 128], strides = [1, 1]} : vector<224x128xf32> to vector<112x128xf32>
    %21 = vector.extract_strided_slice %19 {offsets = [112, 0], sizes = [112, 128], strides = [1, 1]} : vector<224x128xf32> to vector<112x128xf32>
    %cst_14 = arith.constant 0.000000e+00 : f32
    %22 = vector.broadcast %cst_14 : f32 to vector<112x128xf32>
    %23 = arith.maximumf %21, %22 : vector<112x128xf32>
    %24 = arith.truncf %23 : vector<112x128xf32> to vector<112x128xbf16>
    %cst_15 = arith.constant dense<0.000000e+00> : vector<112x128xf32>
    %25 = tpu.matmul %24, %1, %cst_15 {dimension_numbers = #tpu.dot_dimension_numbers<[1], [0], [0], [1], [0, 0, 1, 1], [], []>} : vector<112x128xbf16>, vector<128x128xbf16>, vector<112x128xf32> -> vector<112x128xf32>
    %26 = vector.broadcast %2 : vector<1x128xf32> to vector<112x128xf32>
    %27 = arith.mulf %20, %26 : vector<112x128xf32>
    %28 = arith.addf %27, %25 : vector<112x128xf32>
    %29 = vector.broadcast %3 : vector<1x128xf32> to vector<112x128xf32>
    %30 = arith.addf %28, %29 : vector<112x128xf32>
    %c112 = arith.constant 112 : index
    %c0_16 = arith.constant 0 : index
    %31 = vector.load %arg5[%c112, %c0_16] : memref<224x128xf32, #tpu.memory_space<vmem>>, vector<112x128xf32>
    tpu.vector_store %arg5[%c112, %c0_16], %30 {strides = array<i32>} : memref<224x128xf32, #tpu.memory_space<vmem>>, vector<112x128xf32>,
    return
  }
  func.func @transform_0(%arg0: i32) -> (i32, i32) {
    %c0_i32 = arith.constant 0 : i32
    %c0_i32_0 = arith.constant 0 : i32
    %c0_i32_1 = arith.constant 0 : i32
    return %c0_i32, %c0_i32_0 : i32, i32
  }
  func.func @transform_1(%arg0: i32) -> (i32, i32) {
    %c0_i32 = arith.constant 0 : i32
    %c0_i32_0 = arith.constant 0 : i32
    %c0_i32_1 = arith.constant 0 : i32
    return %c0_i32, %c0_i32_0 : i32, i32
  }
  func.func @transform_2(%arg0: i32) -> (i32, i32) {
    %c0_i32 = arith.constant 0 : i32
    %c0_i32_0 = arith.constant 0 : i32
    %c0_i32_1 = arith.constant 0 : i32
    return %c0_i32, %c0_i32_0 : i32, i32
  }
  func.func @transform_3(%arg0: i32) -> (i32, i32) {
    %c0_i32 = arith.constant 0 : i32
    %c0_i32_0 = arith.constant 0 : i32
    %c0_i32_1 = arith.constant 0 : i32
    return %c0_i32, %c0_i32_0 : i32, i32
  }
  func.func @transform_4(%arg0: i32) -> (i32, i32) {
    %c0_i32 = arith.constant 0 : i32
    %c0_i32_0 = arith.constant 0 : i32
    %c0_i32_1 = arith.constant 0 : i32
    return %c0_i32, %c0_i32_0 : i32, i32
  }
}

</mosaic_0001>

<bundles_post_ra>
// kernel: node_predictor.1
= control target key start
LH: loop header
LB: loop body
LE: loop exit
PB: predicated region body
PF: predicated region fallthrough
CT: control target
= control target key end

     0   :  { %vm68_vm0 = vcmask 195584   ;;  %v1956_v4 = vmov 0.0   ;;  %s1951_s0 = inlined_call_operand.vmem [shape: f32[24,256], index: 0, kind: input, shape index: {}]   ;;  %s1952_s1 = inlined_call_operand.vmem [shape: f32[224,24], index: 1, kind: input, shape index: {}]   ;;  %s1953_s2 = inlined_call_operand.vmem [shape: bf16[128,128], index: 2, kind: input, shape index: {}]   ;;  %s1954_s3 = inlined_call_operand.vmem [shape: f32[8,128], index: 3, kind: input, shape index: {}]   ;;  %s1955_s4 = inlined_call_operand.hbm [shape: f32[224,128], index: 4, kind: output, shape index: {}]  }
   0x1   :  { %v65_v0 = vld [vmem:[%s1951_s0] sm:$0xff]  ;;  %v66_v1 = vld [vmem:[%s1951_s0 + $0x10] sm:$0xff]  ;;  %1320 = vmatprep.subr.bf16.mxu1 %v1956_v4  ;;  %v1423_v6 = vld [vmem:[%s1952_s1 + $0x8] sm:$0xff] }
   0x2   :  { %v1312_v2 = vpack.c.bf16 %v66_v1, %v65_v0  ;;  %v1412_v3 = vld [vmem:[%s1952_s1] sm:$0xff]  ;;  %v1428_v7 = vld [vmem:[%s1952_s1 + $0x10] sm:$0xff]  ;;  %v1435_v8 = vld [vmem:[%s1952_s1 + $0x18] sm:$0xff] }
   0x3   :  { %v67_v5 = vld [vmem:[%s1951_s0 + $0x20] sm:$0xff]  ;;  %1134 = vmatprep.mubr.msk.f32.mxu0 %vm68_vm0, %v1412_v3  ;;  %v1455_v11 = vld [vmem:[%s1952_s1 + $0x28] sm:$0xff]  ;;  %v1463_v12 = vld [vmem:[%s1952_s1 + $0x30] sm:$0xff] }
   0x4   :  { %1313 = vmatprep.subr.bf16.mxu0 %v1312_v2  ;;  %v1443_v9 = vld [vmem:[%s1952_s1 + $0x20] sm:$0xff]  ;;  %v1469_v13 = vld [vmem:[%s1953_s2 + $0x8] sm:$0xff]  }
   0x5   :  { %1315 = vmatpush3.bf16.msra.mxu0 %v1312_v2  ;;  %v1448_v10 = vld [vmem:[%s1953_s2] sm:$0xff]  }
   0x6   :  { %1132 = vmatprep.subr.mxu0 %v67_v5  ;;  %1328 = vmatpush3.bf16.msra.mxu1 %v1448_v10 }
   0x7   :  { %1321 = vmatprep.subr.bf16.mxu1 %v1956_v4 }
   0x9   :  { %1133 = vmatpush3.msra.mxu0 %v67_v5 }
   0xa   :  { %1135 = vmatmul.mubr.msk.f32.vlgmr.msra.gmra.mrb[0].mxu0 %vm68_vm0, %v1423_v6  ;;  %1176 = vmatprep.subr.bf16.mxu0 %v1956_v4 }
   0xb   :  { %1137 = vmatprep.mubr.msk.f32.mxu0 %vm68_vm0, %v1428_v7  ;;  %1177 = vmatpush3.bf16.msra.mxu0 %v1448_v10 }
   0xc   :  { %1178 = vmatprep.subr.bf16.mxu0 %v1956_v4  ;;  %1329 = vmatpush3.bf16.msra.mxu1 %v1469_v13 }
   0xe   :  { %1138 = vmatmul.mubr.msk.f32.gmra.mrb[2].mxu0 %vm68_vm0, %v1435_v8 }
   0xf   :  { %1140 = vmatprep.mubr.msk.f32.mxu0 %vm68_vm0, %v1443_v9 }
  0x12   :  { %1141 = vmatmul.mubr.msk.f32.gmra.mrb[4].mxu0 %vm68_vm0, %v1455_v11 }
  0x13   :  { %9 = vsyncpa [#allocation3], 0  ;;  %1143 = vmatprep.mubr.msk.f32.mxu0 %vm68_vm0, %v1463_v12  ;;  %v1481_v14 = vld [vmem:[%s1952_s1 + $0x38] sm:$0xff]  ;;  %1179 = vmatpush3.bf16.msra.mxu0 %v1469_v13  ;;  %v1487_v15 = vld [vmem:[%s1953_s2 + $0x10] sm:$0xff]   ;;  %vm1374_vm1 = vmmov 0  }
  0x14   :  { %v1492_v16 = vld [vmem:[%s1952_s1 + $0x40] sm:$0xff]  ;;  %1180 = vmatprep.subr.bf16.mxu0 %v1956_v4  ;;  %1322 = vmatprep.subr.bf16.mxu1 %v1956_v4  ;;  %v1504_v17 = vld [vmem:[%s1952_s1 + $0x48] sm:$0xff]  ;;  %v1510_v18 = vld [vmem:[%s1953_s2 + $0x18] sm:$0xff]  }
  0x15   :  { %1330 = vmatpush3.bf16.msra.mxu1 %v1487_v15  ;;  %v1515_v19 = vld [vmem:[%s1952_s1 + $0x50] sm:$0xff]  ;;  %v1527_v20 = vld [vmem:[%s1952_s1 + $0x58] sm:$0xff]  ;;  %v1533_v21 = vld [vmem:[%s1952_s1 + $0x60] sm:$0xff]  ;;  %1196 = vmatprep.mubr.msk.bf16.mxu1 %vm1374_vm1, %v1956_v4 }
  0x16   :  { %1144 = vmatmul.mubr.msk.f32.gmra.mrb[6].mxu0 %vm68_vm0, %v1481_v14  ;;  %1323 = vmatprep.subr.bf16.mxu1 %v1956_v4  ;;  %v1544_v22 = vld [vmem:[%s1952_s1 + $0x68] sm:$0xff]  ;;  %v1549_v23 = vld [vmem:[%s1952_s1 + $0x70] sm:$0xff]  ;;  %v1558_v24 = vld [vmem:[%s1952_s1 + $0x78] sm:$0xff] }
  0x17   :  { %1146 = vmatprep.mubr.msk.f32.mxu0 %vm68_vm0, %v1492_v16  ;;  %1181 = vmatpush3.bf16.msra.mxu0 %v1487_v15  ;;  %v1563_v25 = vld [vmem:[%s1952_s1 + $0x80] sm:$0xff]  ;;  %v1572_v26 = vld [vmem:[%s1952_s1 + $0x88] sm:$0xff]  ;;  %v1577_v27 = vld [vmem:[%s1952_s1 + $0x90] sm:$0xff] }
  0x18   :  { %1182 = vmatprep.subr.bf16.mxu0 %v1956_v4  ;;  %v1586_v28 = vld [vmem:[%s1952_s1 + $0x98] sm:$0xff]  ;;  %v1591_v29 = vld [vmem:[%s1952_s1 + $0xa0] sm:$0xff]  ;;  %v1600_v30 = vld [vmem:[%s1952_s1 + $0xa8] sm:$0xff] }
  0x19   :  { %1331 = vmatpush3.bf16.msra.mxu1 %v1510_v18  ;;  %v1605_v31 = vld [vmem:[%s1952_s1 + $0xb0] sm:$0xff]  ;;  %v1614_v32 = vld [vmem:[%s1952_s1 + $0xb8] sm:$0xff]  ;;  %v1619_v33 = vld [vmem:[%s1952_s1 + $0xc0] sm:$0xff] }
  0x1a   :  { %1147 = vmatmul.mubr.msk.f32.gmra.mrb[8].mxu0 %vm68_vm0, %v1504_v17  ;;  %1324 = vmatprep.subr.bf16.mxu1 %v1956_v4  ;;  %v1628_v34 = vld [vmem:[%s1952_s1 + $0xc8] sm:$0xff]  ;;  %v1633_v35 = vld [vmem:[%s1952_s1 + $0xd0] sm:$0xff]  ;;  %v1642_v36 = vld [vmem:[%s1952_s1 + $0xd8] sm:$0xff] }
  0x1b   :  { %1149 = vmatprep.mubr.msk.f32.mxu0 %vm68_vm0, %v1515_v19  ;;  %1183 = vmatpush3.bf16.msra.mxu0 %v1510_v18  ;;  %v1649_v37 = vld [vmem:[%s1953_s2 + $0x20] sm:$0xff]   ;;  %v1658_v38 = vld [vmem:[%s1953_s2 + $0x28] sm:$0xff]   ;;  %v1667_v39 = vld [vmem:[%s1953_s2 + $0x30] sm:$0xff]  }
  0x1c   :  { %1184 = vmatprep.subr.bf16.mxu0 %v1956_v4  ;;  %v1676_v40 = vld [vmem:[%s1953_s2 + $0x38] sm:$0xff]   ;;  %v580_v41 = vld [vmem:[%s1951_s0 + $0x8] sm:$0xff] }
  0x1d   :  { %1332 = vmatpush3.bf16.msra.mxu1 %v1649_v37  ;;  %v581_v42 = vld [vmem:[%s1951_s0 + $0x18] sm:$0xff]  ;;  %v582_v2 = vld [vmem:[%s1951_s0 + $0x28] sm:$0xff] }
  0x1e   :  { %1150 = vmatmul.mubr.msk.f32.gmra.mrb[10].mxu0 %vm68_vm0, %v1527_v20  ;;  %1325 = vmatprep.subr.bf16.mxu1 %v1956_v4  ;;  %v1316_v43 = vpack.c.bf16 %v581_v42, %v580_v41 }
  0x1f   :  { %1152 = vmatprep.mubr.msk.f32.mxu0 %vm68_vm0, %v1533_v21  ;;  %1185 = vmatpush3.bf16.msra.mxu0 %v1649_v37 }
  0x20   :  { %1186 = vmatprep.subr.bf16.mxu0 %v1956_v4 }
  0x21   :  { %1333 = vmatpush3.bf16.msra.mxu1 %v1658_v38 }
  0x22   :  { %1153 = vmatmul.mubr.msk.f32.gmra.mrb[12].mxu0 %vm68_vm0, %v1544_v22  ;;  %1326 = vmatprep.subr.bf16.mxu1 %v1956_v4 }
  0x23   :  { %1155 = vmatprep.mubr.msk.f32.mxu0 %vm68_vm0, %v1549_v23  ;;  %1187 = vmatpush3.bf16.msra.mxu0 %v1658_v38 }
  0x24   :  { %1188 = vmatprep.subr.bf16.mxu0 %v1956_v4 }
  0x25   :  { %1334 = vmatpush3.bf16.msra.mxu1 %v1667_v39 }
  0x26   :  { %1156 = vmatmul.mubr.msk.f32.gmra.mrb[14].mxu0 %vm68_vm0, %v1558_v24  ;;  %1327 = vmatprep.subr.bf16.mxu1 %v1956_v4 }
  0x27   :  { %1158 = vmatprep.mubr.msk.f32.mxu0 %vm68_vm0, %v1563_v25  ;;  %1189 = vmatpush3.bf16.msra.mxu0 %v1667_v39 }
  0x28   :  { %1190 = vmatprep.subr.bf16.mxu0 %v1956_v4 }
  0x29   :  { %1335 = vmatpush3.bf16.msra.mxu1 %v1676_v40 }
  0x2a   :  { %1159 = vmatmul.mubr.msk.f32.gmra.mrb[16].mxu0 %vm68_vm0, %v1572_v26  ;;  %1268 = vmatprep.subr.bf16.mxu1 %v1956_v4 }
  0x2b   :  { %1161 = vmatprep.mubr.msk.f32.mxu0 %vm68_vm0, %v1577_v27  ;;  %1191 = vmatpush3.bf16.msra.mxu0 %v1676_v40 }
  0x2c   :  { %1317 = vmatprep.subr.bf16.mxu0 %v1316_v43 }
  0x2e   :  { %1162 = vmatmul.mubr.msk.f32.gmra.mrb[18].mxu0 %vm68_vm0, %v1586_v28 }
  0x2f   :  { %1164 = vmatprep.mubr.msk.f32.mxu0 %vm68_vm0, %v1591_v29 }
  0x32   :  { %1165 = vmatmul.mubr.msk.f32.gmra.mrb[20].mxu0 %vm68_vm0, %v1600_v30 }
  0x33   :  { %1167 = vmatprep.mubr.msk.f32.mxu0 %vm68_vm0, %v1605_v31 }
  0x36   :  { %1168 = vmatmul.mubr.msk.f32.gmra.mrb[22].mxu0 %vm68_vm0, %v1614_v32 }
  0x37   :  { %1170 = vmatprep.mubr.msk.f32.mxu0 %vm68_vm0, %v1619_v33 }
  0x3a   :  { %1171 = vmatmul.mubr.msk.f32.gmra.mrb[24].mxu0 %vm68_vm0, %v1628_v34 }
  0x3b   :  { %1173 = vmatprep.mubr.msk.f32.mxu0 %vm68_vm0, %v1633_v35 }
  0x3e   :  { %1174 = vmatmul.mubr.msk.f32.gmra.mrb[26].mxu0 %vm68_vm0, %v1642_v36 }
  0x3f   :  { %1192 = vmatprep.mubr.msk.bf16.mxu0 %vm1374_vm1, %v1956_v4 }
  0xdd   :  { %v1691_v44 = vpop.f32.mrb[0].mxu0 }
  0xde   :  { %v1693_v45 = vpop.f32.mrb[1].mxu0 }
  0xe1   :  { %v1695_v46 = vpop.f32.mrb[2].mxu0 }
  0xe2   :  { %v1697_v47 = vpop.f32.mrb[3].mxu0 }
  0xe5   :  { %v1699_v48 = vpop.f32.mrb[4].mxu0 }
  0xe6   :  { %v1701_v49 = vpop.f32.mrb[5].mxu0 }
  0xe9   :  { %v1703_v50 = vpop.f32.mrb[6].mxu0 }
  0xea   :  { %v1705_v51 = vpop.f32.mrb[7].mxu0 }
  0xed   :  { %v1707_v52 = vpop.f32.mrb[8].mxu0 }
  0xee   :  { %v1709_v53 = vpop.f32.mrb[9].mxu0 }
  0xf1   :  { %v1711_v54 = vpop.f32.mrb[10].mxu0 }
  0xf2   :  { %v1713_v55 = vpop.f32.mrb[11].mxu0 }
  0xf5   :  { %v1715_v56 = vpop.f32.mrb[12].mxu0 }
  0xf6   :  { %v1717_v57 = vpop.f32.mrb[13].mxu0 }
  0xf9   :  { %v1157_v58 = vpop.f32.mrb[14].mxu0 }
  0xfa   :  { %v359_v59 = vmax.f32 %v1157_v58, 0.0  ;;  %v289_v60 = vpop.f32.mrb[15].mxu0 }
  0xfb   :  { %v358_v61 = vmax.f32 %v289_v60, 0.0  ;;  %v1958_v60 = vmov 0.0  }
  0xfd   :  { %v372_v62 = vpack.c.bf16 %v359_v59, %v358_v61  ;;  %v1160_v63 = vpop.f32.mrb[16].mxu0 }
  0xfe   :  { %v361_v0 = vmax.f32 %v1160_v63, 0.0  ;;  %v299_v1 = vpop.f32.mrb[17].mxu0 }
  0xff   :  { %v360_v5 = vmax.f32 %v299_v1, 0.0  ;;  %1193 = vmatmul.mubr.bf16.vlgmr.msra.gmra.mrb[28].mxu0 %v372_v62 }
 0x100   :  { %1319 = vmatpush3.bf16.msra.mxu0 %v1316_v43  ;;  %1226 = vmatprep.mubr.msk.f32.mxu0 %vm68_vm0, %v1412_v3 }
 0x101   :  { %v373_v41 = vpack.c.bf16 %v361_v0, %v360_v5  ;;  %1224 = vmatprep.subr.mxu0 %v582_v2  ;;  %v1163_v42 = vpop.f32.mrb[18].mxu0 }
 0x102   :  { %v363_v58 = vmax.f32 %v1163_v42, 0.0  ;;  %v309_v4 = vpop.f32.mrb[19].mxu0 }
 0x103   :  { %1197 = vmatmul.mubr.bf16.vlgmr.msra.gmra.mrb[0].mxu1 %v373_v41  ;;  %v362_v59 = vmax.f32 %v309_v4, 0.0 }
 0x104   :  { %1225 = vmatpush3.msra.mxu0 %v582_v2  ;;  %1200 = vmatprep.mubr.msk.bf16.mxu1 %vm1374_vm1, %v1958_v60 }
 0x105   :  { %v374_v61 = vpack.c.bf16 %v363_v58, %v362_v59  ;;  %v1166_v63 = vpop.f32.mrb[20].mxu0  ;;  %1269 = vmatpush3.bf16.msra.mxu1 %v1448_v10 }
 0x106   :  { %v365_v62 = vmax.f32 %v1166_v63, 0.0  ;;  %v319_v43 = vpop.f32.mrb[21].mxu0  ;;  %1270 = vmatprep.subr.bf16.mxu1 %v1958_v60 }
 0x107   :  { %1227 = vmatmul.mubr.msk.f32.vlgmr.msra.gmra.mrb[32].mxu0 %vm68_vm0, %v1423_v6  ;;  %v364_v3 = vmax.f32 %v319_v43, 0.0 }
 0x108   :  { %1229 = vmatprep.mubr.msk.f32.mxu0 %vm68_vm0, %v1428_v7 }
 0x109   :  { %v375_v4 = vpack.c.bf16 %v365_v62, %v364_v3  ;;  %v1169_v0 = vpop.f32.mrb[22].mxu0  ;;  %1271 = vmatpush3.bf16.msra.mxu1 %v1469_v13 }
 0x10a   :  { %v367_v1 = vmax.f32 %v1169_v0, 0.0  ;;  %v329_v2 = vpop.f32.mrb[23].mxu0  ;;  %1272 = vmatprep.subr.bf16.mxu1 %v1958_v60 }
 0x10b   :  { %1201 = vmatmul.mubr.bf16.gmra.mrb[4].mxu1 %v374_v61  ;;  %1230 = vmatmul.mubr.msk.f32.gmra.mrb[34].mxu0 %vm68_vm0, %v1435_v8  ;;  %v366_v10 = vmax.f32 %v329_v2, 0.0 }
 0x10c   :  { %1232 = vmatprep.mubr.msk.f32.mxu0 %vm68_vm0, %v1443_v9  ;;  %1204 = vmatprep.mubr.msk.bf16.mxu1 %vm1374_vm1, %v1958_v60 }
 0x10d   :  { %v376_v6 = vpack.c.bf16 %v367_v1, %v366_v10  ;;  %v1172_v7 = vpop.f32.mrb[24].mxu0  ;;  %1273 = vmatpush3.bf16.msra.mxu1 %v1487_v15 }
 0x10e   :  { %v369_v13 = vmax.f32 %v1172_v7, 0.0  ;;  %v339_v5 = vpop.f32.mrb[25].mxu0  ;;  %1274 = vmatprep.subr.bf16.mxu1 %v1958_v60 }
 0x10f   :  { %1233 = vmatmul.mubr.msk.f32.gmra.mrb[36].mxu0 %vm68_vm0, %v1455_v11  ;;  %v368_v41 = vmax.f32 %v339_v5, 0.0 }
 0x110   :  { %1235 = vmatprep.mubr.msk.f32.mxu0 %vm68_vm0, %v1463_v12  ;;  %v1808_v12 = vld [vmem:[%s1954_s3] ss:$0 sm:$0xff] }
 0x111   :  { %v377_v8 = vpack.c.bf16 %v369_v13, %v368_v41  ;;  %v1175_v9 = vpop.f32.mrb[26].mxu0  ;;  %1275 = vmatpush3.bf16.msra.mxu1 %v1510_v18  ;;  %v521_v18 = vmul.f32 %v1691_v44, %v1808_v12  ;;  %v525_v44 = vmul.f32 %v1699_v48, %v1808_v12  ;;  %v527_v1 = vmul.f32 %v1703_v50, %v1808_v12 }
 0x112   :  { %v371_v42 = vmax.f32 %v1175_v9, 0.0  ;;  %v349_v58 = vpop.f32.mrb[27].mxu0  ;;  %1276 = vmatprep.subr.bf16.mxu1 %v1958_v60 }
 0x113   :  { %1205 = vmatmul.mubr.bf16.gmra.mrb[8].mxu1 %v375_v4  ;;  %1236 = vmatmul.mubr.msk.f32.gmra.mrb[38].mxu0 %vm68_vm0, %v1481_v14  ;;  %v370_v15 = vmax.f32 %v349_v58, 0.0  ;;  %v520_v14 = vmul.f32 %v1808_v12, %v1693_v45  ;;  %v526_v4 = vmul.f32 %v1808_v12, %v1705_v51 }
 0x114   :  { %1238 = vmatprep.mubr.msk.f32.mxu0 %vm68_vm0, %v1492_v16  ;;  %1208 = vmatprep.mubr.msk.bf16.mxu1 %vm1374_vm1, %v1958_v60  ;;  %v1815_v16 = vld [vmem:[%s1954_s3 + $0x1] ss:$0 sm:$0xff]  ;;  %s1375_s3 = smov [#allocation2]  }
 0x115   :  { %v378_v11 = vpack.c.bf16 %v371_v42, %v370_v15  ;;  %1277 = vmatpush3.bf16.msra.mxu1 %v1649_v37  ;;  %v528_v42 = vmul.f32 %v1808_v12, %v1709_v53  ;;  %v529_v15 = vmul.f32 %v1707_v52, %v1808_v12  ;;  %s959_s22 = sshll.u32 %s1375_s3, 4  ;;  %s960_s22 = int_to_ptr.vmem [resolvable:$true] %s959_s22 }
 0x116   :  { %1278 = vmatprep.subr.bf16.mxu1 %v1958_v60  ;;  %s1349_s23 = scalar_lea.vmem %s960_s22, 3584  ;;  %p1354_p1 = scmp.lt.s32.totalorder %s960_s22, %s960_s22 }
 0x117   :  { %1239 = vmatmul.mubr.msk.f32.gmra.mrb[40].mxu0 %vm68_vm0, %v1504_v17  ;;  %p1350_p0 = scmp.ne.s32.totalorder %s960_s22, %s1349_s23  ;;  %p1355_p2 = scmp.lt.s32.totalorder %s1349_s23, %s1349_s23 }
 0x118   :  { %1241 = vmatprep.mubr.msk.f32.mxu0 %vm68_vm0, %v1515_v19 }
 0x119   :  { %1279 = vmatpush3.bf16.msra.mxu1 %v1658_v38  ;;  %v524_v38 = vmul.f32 %v1808_v12, %v1701_v49  ;;  %p1356_p3 = por %p1355_p2, %p1354_p1 }
 0x11a   :  { %1280 = vmatprep.subr.bf16.mxu1 %v1958_v60 }
 0x11b   :  { %1209 = vmatmul.mubr.bf16.gmra.mrb[12].mxu1 %v376_v6  ;;  %1242 = vmatmul.mubr.msk.f32.gmra.mrb[42].mxu0 %vm68_vm0, %v1527_v20  ;;  %p1357_p4 = pnand %p1356_p3, %p1350_p0 }
 0x11c   :  { %1244 = vmatprep.mubr.msk.f32.mxu0 %vm68_vm0, %v1533_v21  ;;  %1212 = vmatprep.mubr.msk.bf16.mxu1 %vm1374_vm1, %v1958_v60 }
 0x11d   :  { %1281 = vmatpush3.bf16.msra.mxu1 %v1667_v39 }
 0x11e   :  { %1282 = vmatprep.subr.bf16.mxu1 %v1958_v60 }
 0x11f   :  { %1245 = vmatmul.mubr.msk.f32.gmra.mrb[44].mxu0 %vm68_vm0, %v1544_v22  ;;  %v522_v22 = vmul.f32 %v1808_v12, %v1697_v47 }
 0x120   :  { %1247 = vmatprep.mubr.msk.f32.mxu0 %vm68_vm0, %v1549_v23 }
 0x121   :  { %1283 = vmatpush3.bf16.msra.mxu1 %v1676_v40 }
 0x123   :  { %1213 = vmatmul.mubr.bf16.gmra.mrb[16].mxu1 %v377_v8  ;;  %1248 = vmatmul.mubr.msk.f32.gmra.mrb[46].mxu0 %vm68_vm0, %v1558_v24 }
 0x124   :  { %1250 = vmatprep.mubr.msk.f32.mxu0 %vm68_vm0, %v1563_v25  ;;  %1216 = vmatprep.mubr.msk.bf16.mxu1 %vm1374_vm1, %v1958_v60 }
 0x127   :  { %1251 = vmatmul.mubr.msk.f32.gmra.mrb[48].mxu0 %vm68_vm0, %v1572_v26 }
 0x128   :  { %1253 = vmatprep.mubr.msk.f32.mxu0 %vm68_vm0, %v1577_v27  ;;  %v523_v27 = vmul.f32 %v1695_v46, %v1808_v12 }
 0x12b   :  { %1217 = vmatmul.mubr.bf16.gmra.mrb[20].mxu1 %v378_v11  ;;  %1254 = vmatmul.mubr.msk.f32.gmra.mrb[50].mxu0 %vm68_vm0, %v1586_v28 }
 0x12c   :  { %1256 = vmatprep.mubr.msk.f32.mxu0 %vm68_vm0, %v1591_v29  ;;  %1284 = vmatprep.mubr.msk.bf16.mxu1 %vm1374_vm1, %v1958_v60 }
 0x12f   :  { %1257 = vmatmul.mubr.msk.f32.gmra.mrb[52].mxu0 %vm68_vm0, %v1600_v30 }
 0x130   :  { %1259 = vmatprep.mubr.msk.f32.mxu0 %vm68_vm0, %v1605_v31 }
 0x133   :  { %1260 = vmatmul.mubr.msk.f32.gmra.mrb[54].mxu0 %vm68_vm0, %v1614_v32 }
 0x134   :  { %1262 = vmatprep.mubr.msk.f32.mxu0 %vm68_vm0, %v1619_v33 }
 0x137   :  { %1263 = vmatmul.mubr.msk.f32.gmra.mrb[56].mxu0 %vm68_vm0, %v1628_v34 }
 0x138   :  { %1265 = vmatprep.mubr.msk.f32.mxu0 %vm68_vm0, %v1633_v35 }
 0x13b   :  { %1266 = vmatmul.mubr.msk.f32.gmra.mrb[58].mxu0 %vm68_vm0, %v1642_v36 }
 0x1d2   :  { %v461_v17 = vpop.f32.mrb[28].mxu0 }
 0x1d3   :  { %v534_v19 = vadd.f32 %v520_v14, %v461_v17  ;;  %v1194_v20 = vpop.f32.mrb[29].mxu0 }
 0x1d4   :  { %v464_v21 = vpop.f32.mrb[30].mxu0 }
 0x1d5   :  { %v552_v23 = vadd.f32 %v1815_v16, %v534_v19  ;;  %v535_v24 = vadd.f32 %v521_v18, %v464_v21  ;;  %v1195_v25 = vpop.f32.mrb[31].mxu0 }
 0x1d6   :  { %v469_v26 = vpop.f32.mrb[0].mxu1 }
 0x1d7   :  { %566 = vst [vmem:[#allocation2] sm:$0xff] %v552_v23  ;;  %v553_v28 = vadd.f32 %v1815_v16, %v535_v24  ;;  %v536_v29 = vadd.f32 %v522_v22, %v469_v26  ;;  %v1198_v30 = vpop.f32.mrb[1].mxu1  ;;  %v530_v24 = vmul.f32 %v1808_v12, %v1713_v55  ;;  %v531_v26 = vmul.f32 %v1711_v54, %v1808_v12 }
 0x1d8   :  { %v472_v31 = vpop.f32.mrb[2].mxu1  ;;  %v532_v54 = vmul.f32 %v1808_v12, %v1717_v57 }
 0x1d9   :  { %567 = vst [vmem:[#allocation2 + $0x8] sm:$0xff] %v553_v28  ;;  %v554_v32 = vadd.f32 %v1815_v16, %v536_v29  ;;  %v537_v33 = vadd.f32 %v523_v27, %v472_v31  ;;  %v1199_v34 = vpop.f32.mrb[3].mxu1 }
 0x1da   :  { %v1826_v35 = vpop.f32.mrb[32].mxu0 }
 0x1db   :  { %568 = vst [vmem:[#allocation2 + $0x10] sm:$0xff] %v554_v32  ;;  %v555_v36 = vadd.f32 %v1815_v16, %v537_v33  ;;  %v1829_v37 = vpop.f32.mrb[33].mxu0 }
 0x1dd   :  { %569 = vst [vmem:[#allocation2 + $0x18] sm:$0xff] %v555_v36 }
 0x1de   :  { %v477_v39 = vpop.f32.mrb[4].mxu1  ;;  %v1833_v40 = vpop.f32.mrb[34].mxu0 }
 0x1df   :  { %v538_v45 = vadd.f32 %v524_v38, %v477_v39  ;;  %v1202_v46 = vpop.f32.mrb[5].mxu1  ;;  %v1837_v47 = vpop.f32.mrb[35].mxu0 }
 0x1e0   :  { %v480_v59 = vpop.f32.mrb[6].mxu1 }
 0x1e1   :  { %v556_v61 = vadd.f32 %v1815_v16, %v538_v45  ;;  %v539_v63 = vadd.f32 %v525_v44, %v480_v59  ;;  %v1203_v62 = vpop.f32.mrb[7].mxu1 }
 0x1e2   :  { %v1840_v43 = vpop.f32.mrb[36].mxu0  ;;  %v533_v62 = vmul.f32 %v1715_v56, %v1808_v12 }
 0x1e3   :  { %570 = vst [vmem:[#allocation2 + $0x20] sm:$0xff] %v556_v61  ;;  %v557_v49 = vadd.f32 %v1815_v16, %v539_v63  ;;  %v1843_v3 = vpop.f32.mrb[37].mxu0 }
 0x1e5   :  { %571 = vst [vmem:[#allocation2 + $0x28] sm:$0xff] %v557_v49 }
 0x1e6   :  { %v485_v48 = vpop.f32.mrb[8].mxu1  ;;  %v1847_v0 = vpop.f32.mrb[38].mxu0 }
 0x1e7   :  { %v540_v2 = vadd.f32 %v526_v4, %v485_v48  ;;  %v1206_v10 = vpop.f32.mrb[9].mxu1  ;;  %v1851_v6 = vpop.f32.mrb[39].mxu0 }
 0x1e8   :  { %v488_v7 = vpop.f32.mrb[10].mxu1 }
 0x1e9   :  { %v558_v13 = vadd.f32 %v1815_v16, %v540_v2  ;;  %v541_v5 = vadd.f32 %v527_v1, %v488_v7  ;;  %v1207_v41 = vpop.f32.mrb[11].mxu1 }
 0x1ea   :  { %v1854_v8 = vpop.f32.mrb[40].mxu0 }
 0x1eb   :  { %572 = vst [vmem:[#allocation2 + $0x30] sm:$0xff] %v558_v13  ;;  %v559_v51 = vadd.f32 %v1815_v16, %v541_v5  ;;  %v1857_v9 = vpop.f32.mrb[41].mxu0 }
 0x1ed   :  { %573 = vst [vmem:[#allocation2 + $0x38] sm:$0xff] %v559_v51 }
 0x1ee   :  { %v493_v50 = vpop.f32.mrb[12].mxu1  ;;  %v1861_v58 = vpop.f32.mrb[42].mxu0 }
 0x1ef   :  { %v542_v11 = vadd.f32 %v528_v42, %v493_v50  ;;  %v1210_v14 = vpop.f32.mrb[13].mxu1  ;;  %v1865_v17 = vpop.f32.mrb[43].mxu0 }
 0x1f0   :  { %v496_v18 = vpop.f32.mrb[14].mxu1 }
 0x1f1   :  { %v560_v19 = vadd.f32 %v1815_v16, %v542_v11  ;;  %v543_v20 = vadd.f32 %v529_v15, %v496_v18  ;;  %v1211_v21 = vpop.f32.mrb[15].mxu1 }
 0x1f2   :  { %v1868_v22 = vpop.f32.mrb[44].mxu0 }
 0x1f3   :  { %574 = vst [vmem:[#allocation2 + $0x40] sm:$0xff] %v560_v19  ;;  %v561_v53 = vadd.f32 %v1815_v16, %v543_v20  ;;  %v1871_v23 = vpop.f32.mrb[45].mxu0 }
 0x1f5   :  { %575 = vst [vmem:[#allocation2 + $0x48] sm:$0xff] %v561_v53 }
 0x1f6   :  { %v501_v52 = vpop.f32.mrb[16].mxu1  ;;  %v1249_v25 = vpop.f32.mrb[46].mxu0 }
 0x1f7   :  { %v544_v27 = vadd.f32 %v530_v24, %v501_v52  ;;  %v789_v28 = vmax.f32 %v1249_v25, 0.0  ;;  %v1214_v29 = vpop.f32.mrb[17].mxu1  ;;  %v719_v30 = vpop.f32.mrb[47].mxu0 }
 0x1f8   :  { %v788_v31 = vmax.f32 %v719_v30, 0.0  ;;  %v504_v32 = vpop.f32.mrb[18].mxu1 }
 0x1f9   :  { %v562_v33 = vadd.f32 %v1815_v16, %v544_v27  ;;  %v545_v34 = vadd.f32 %v531_v26, %v504_v32  ;;  %v1215_v36 = vpop.f32.mrb[19].mxu1 }
 0x1fa   :  { %v802_v38 = vpack.c.bf16 %v789_v28, %v788_v31  ;;  %v1252_v39 = vpop.f32.mrb[48].mxu0  ;;  %v898_v31 = vmul.f32 %v1808_v12, %v1829_v37  ;;  %v901_v37 = vmul.f32 %v1833_v40, %v1808_v12 }
 0x1fb   :  { %576 = vst [vmem:[#allocation2 + $0x50] sm:$0xff] %v562_v33  ;;  %v563_v55 = vadd.f32 %v1815_v16, %v545_v34  ;;  %v791_v44 = vmax.f32 %v1252_v39, 0.0  ;;  %v729_v45 = vpop.f32.mrb[49].mxu0  ;;  %v899_v33 = vmul.f32 %v1826_v35, %v1808_v12 }
 0x1fc   :  { %1285 = vmatmul.mubr.bf16.vlgmr.msra.gmra.mrb[24].mxu1 %v802_v38  ;;  %v790_v46 = vmax.f32 %v729_v45, 0.0 }
 0x1fd   :  { %577 = vst [vmem:[#allocation2 + $0x58] sm:$0xff] %v563_v55  ;;  %1288 = vmatprep.mubr.msk.bf16.mxu1 %vm1374_vm1, %v1958_v60 }
 0x1fe   :  { %v509_v59 = vpop.f32.mrb[20].mxu1  ;;  %v803_v61 = vpack.c.bf16 %v791_v44, %v790_v46  ;;  %v1255_v63 = vpop.f32.mrb[50].mxu0 }
 0x1ff   :  { %v546_v49 = vadd.f32 %v532_v54, %v509_v59  ;;  %v1218_v4 = vpop.f32.mrb[21].mxu1  ;;  %v793_v48 = vmax.f32 %v1255_v63, 0.0  ;;  %v739_v1 = vpop.f32.mrb[51].mxu0 }
 0x200   :  { %v512_v2 = vpop.f32.mrb[22].mxu1  ;;  %v792_v10 = vmax.f32 %v739_v1, 0.0  ;;  %v902_v4 = vmul.f32 %v1808_v12, %v1843_v3 }
 0x201   :  { %v564_v7 = vadd.f32 %v1815_v16, %v546_v49  ;;  %v547_v13 = vadd.f32 %v533_v62, %v512_v2  ;;  %v1219_v57 = vpop.f32.mrb[23].mxu1 }
 0x202   :  { %v804_v5 = vpack.c.bf16 %v793_v48, %v792_v10  ;;  %v1258_v41 = vpop.f32.mrb[52].mxu0  ;;  %v903_v48 = vmul.f32 %v1840_v43, %v1808_v12 }
 0x203   :  { %578 = vst [vmem:[#allocation2 + $0x60] sm:$0xff] %v564_v7  ;;  %v565_v51 = vadd.f32 %v1815_v16, %v547_v13  ;;  %v795_v42 = vmax.f32 %v1258_v41, 0.0  ;;  %v749_v50 = vpop.f32.mrb[53].mxu0  ;;  %v905_v41 = vmul.f32 %v1847_v0, %v1808_v12 }
 0x204   :  { %1289 = vmatmul.mubr.bf16.gmra.mrb[28].mxu1 %v803_v61  ;;  %v794_v15 = vmax.f32 %v749_v50, 0.0 }
 0x205   :  { %579 = vst [vmem:[#allocation2 + $0x68] sm:$0xff] %v565_v51  ;;  %1292 = vmatprep.mubr.msk.bf16.mxu1 %vm1374_vm1, %v1958_v60 }
 0x206   :  { %v805_v56 = vpack.c.bf16 %v795_v42, %v794_v15  ;;  %v1261_v11 = vpop.f32.mrb[54].mxu0 }
 0x207   :  { %v797_v14 = vmax.f32 %v1261_v11, 0.0  ;;  %v759_v18 = vpop.f32.mrb[55].mxu0 }
 0x208   :  { %v796_v19 = vmax.f32 %v759_v18, 0.0  ;;  %v907_v18 = vmul.f32 %v1854_v8, %v1808_v12 }
 0x20a   :  { %v806_v20 = vpack.c.bf16 %v797_v14, %v796_v19  ;;  %v1264_v21 = vpop.f32.mrb[56].mxu0  ;;  %v906_v14 = vmul.f32 %v1808_v12, %v1857_v9 }
 0x20b   :  { %v799_v53 = vmax.f32 %v1264_v21, 0.0  ;;  %v769_v24 = vpop.f32.mrb[57].mxu0 }
 0x20c   :  { %1293 = vmatmul.mubr.bf16.gmra.mrb[32].mxu1 %v804_v5  ;;  %v798_v52 = vmax.f32 %v769_v24, 0.0  ;;  %v904_v5 = vmul.f32 %v1808_v12, %v1851_v6 }
 0x20d   :  { %1296 = vmatprep.mubr.msk.bf16.mxu1 %vm1374_vm1, %v1958_v60 }
 0x20e   :  { %v807_v25 = vpack.c.bf16 %v799_v53, %v798_v52  ;;  %v1267_v26 = vpop.f32.mrb[58].mxu0 }
 0x20f   :  { %v801_v27 = vmax.f32 %v1267_v26, 0.0  ;;  %v779_v28 = vpop.f32.mrb[59].mxu0  ;;  %v909_v26 = vmul.f32 %v1861_v58, %v1808_v12 }
 0x210   :  { %v800_v29 = vmax.f32 %v779_v28, 0.0 }
 0x212   :  { %v808_v30 = vpack.c.bf16 %v801_v27, %v800_v29 }
 0x214   :  { %1297 = vmatmul.mubr.bf16.gmra.mrb[36].mxu1 %v805_v56 }
 0x215   :  { %1300 = vmatprep.mubr.msk.bf16.mxu1 %vm1374_vm1, %v1958_v60 }
 0x21c   :  { %1301 = vmatmul.mubr.bf16.gmra.mrb[40].mxu1 %v806_v20 }
 0x21d   :  { %1304 = vmatprep.mubr.msk.bf16.mxu1 %vm1374_vm1, %v1958_v60 }
 0x224   :  { %1305 = vmatmul.mubr.bf16.gmra.mrb[44].mxu1 %v807_v25  ;;  %v908_v25 = vmul.f32 %v1808_v12, %v1865_v17 }
 0x225   :  { %1308 = vmatprep.mubr.msk.bf16.mxu1 %vm1374_vm1, %v1958_v60  ;;  %v900_v60 = vmul.f32 %v1808_v12, %v1837_v47 }
 0x22c   :  { %1309 = vmatmul.mubr.bf16.gmra.mrb[48].mxu1 %v808_v30 }
 0x2cf   :  { %v843_v32 = vpop.f32.mrb[24].mxu1 }
 0x2d0   :  { %v912_v34 = vadd.f32 %v898_v31, %v843_v32  ;;  %v1286_v36 = vpop.f32.mrb[25].mxu1 }
 0x2d1   :  { %v846_v38 = vpop.f32.mrb[26].mxu1 }
 0x2d2   :  { %v926_v39 = vadd.f32 %v1815_v16, %v912_v34  ;;  %v913_v55 = vadd.f32 %v899_v33, %v846_v38  ;;  %v1287_v44 = vpop.f32.mrb[27].mxu1  ;;  %v910_v33 = vmul.f32 %v1808_v12, %v1871_v23  ;;  %v911_v34 = vmul.f32 %v1868_v22, %v1808_v12 }
 0x2d4   :  { %940 = vst [vmem:[#allocation2 + $0x70] sm:$0xff] %v926_v39  ;;  %v927_v45 = vadd.f32 %v1815_v16, %v913_v55 }
 0x2d6   :  { %941 = vst [vmem:[#allocation2 + $0x78] sm:$0xff] %v927_v45 }
 0x2d7   :  { %v851_v46 = vpop.f32.mrb[28].mxu1 }
 0x2d8   :  { %v914_v54 = vadd.f32 %v900_v60, %v851_v46  ;;  %v1290_v35 = vpop.f32.mrb[29].mxu1 }
 0x2d9   :  { %v854_v59 = vpop.f32.mrb[30].mxu1 }
 0x2da   :  { %v928_v61 = vadd.f32 %v1815_v16, %v914_v54  ;;  %v915_v63 = vadd.f32 %v901_v37, %v854_v59  ;;  %v1291_v62 = vpop.f32.mrb[31].mxu1 }
 0x2dc   :  { %942 = vst [vmem:[#allocation2 + $0x80] sm:$0xff] %v928_v61  ;;  %v929_v49 = vadd.f32 %v1815_v16, %v915_v63 }
 0x2de   :  { %943 = vst [vmem:[#allocation2 + $0x88] sm:$0xff] %v929_v49 }
 0x2df   :  { %v859_v47 = vpop.f32.mrb[32].mxu1 }
 0x2e0   :  { %v916_v1 = vadd.f32 %v902_v4, %v859_v47  ;;  %v1294_v40 = vpop.f32.mrb[33].mxu1 }
 0x2e1   :  { %v862_v2 = vpop.f32.mrb[34].mxu1 }
 0x2e2   :  { %v930_v10 = vadd.f32 %v1815_v16, %v916_v1  ;;  %v917_v7 = vadd.f32 %v903_v48, %v862_v2  ;;  %v1295_v13 = vpop.f32.mrb[35].mxu1 }
 0x2e4   :  { %944 = vst [vmem:[#allocation2 + $0x90] sm:$0xff] %v930_v10  ;;  %v931_v57 = vadd.f32 %v1815_v16, %v917_v7 }
 0x2e6   :  { %945 = vst [vmem:[#allocation2 + $0x98] sm:$0xff] %v931_v57 }
 0x2e7   :  { %v867_v3 = vpop.f32.mrb[36].mxu1 }
 0x2e8   :  { %v918_v51 = vadd.f32 %v904_v5, %v867_v3  ;;  %v1298_v43 = vpop.f32.mrb[37].mxu1 }
 0x2e9   :  { %v870_v42 = vpop.f32.mrb[38].mxu1 }
 0x2ea   :  { %v932_v50 = vadd.f32 %v1815_v16, %v918_v51  ;;  %v919_v15 = vadd.f32 %v905_v41, %v870_v42  ;;  %v1299_v56 = vpop.f32.mrb[39].mxu1 }
 0x2ec   :  { %946 = vst [vmem:[#allocation2 + $0xa0] sm:$0xff] %v932_v50  ;;  %v933_v11 = vadd.f32 %v1815_v16, %v919_v15 }
 0x2ee   :  { %947 = vst [vmem:[#allocation2 + $0xa8] sm:$0xff] %v933_v11 }
 0x2ef   :  { %v875_v6 = vpop.f32.mrb[40].mxu1 }
 0x2f0   :  { %v920_v19 = vadd.f32 %v906_v14, %v875_v6  ;;  %v1302_v0 = vpop.f32.mrb[41].mxu1 }
 0x2f1   :  { %v878_v20 = vpop.f32.mrb[42].mxu1 }
 0x2f2   :  { %v934_v21 = vadd.f32 %v1815_v16, %v920_v19  ;;  %v921_v53 = vadd.f32 %v907_v18, %v878_v20  ;;  %v1303_v24 = vpop.f32.mrb[43].mxu1 }
 0x2f4   :  { %948 = vst [vmem:[#allocation2 + $0xb0] sm:$0xff] %v934_v21  ;;  %v935_v52 = vadd.f32 %v1815_v16, %v921_v53 }
 0x2f6   :  { %949 = vst [vmem:[#allocation2 + $0xb8] sm:$0xff] %v935_v52 }
 0x2f7   :  { %v883_v9 = vpop.f32.mrb[44].mxu1 }
 0x2f8   :  { %v922_v27 = vadd.f32 %v908_v25, %v883_v9  ;;  %v1306_v8 = vpop.f32.mrb[45].mxu1 }
 0x2f9   :  { %v886_v28 = vpop.f32.mrb[46].mxu1 }
 0x2fa   :  { %v936_v29 = vadd.f32 %v1815_v16, %v922_v27  ;;  %v923_v30 = vadd.f32 %v909_v26, %v886_v28  ;;  %v1307_v31 = vpop.f32.mrb[47].mxu1 }
 0x2fc   :  { %950 = vst [vmem:[#allocation2 + $0xc0] sm:$0xff] %v936_v29  ;;  %v937_v32 = vadd.f32 %v1815_v16, %v923_v30 }
 0x2fe   :  { %951 = vst [vmem:[#allocation2 + $0xc8] sm:$0xff] %v937_v32 }
 0x2ff   :  { %v891_v17 = vpop.f32.mrb[48].mxu1 }
 0x300   :  { %v924_v36 = vadd.f32 %v910_v33, %v891_v17  ;;  %v1310_v58 = vpop.f32.mrb[49].mxu1 }
 0x301   :  { %v894_v38 = vpop.f32.mrb[50].mxu1 }
 0x302   :  { %v938_v39 = vadd.f32 %v1815_v16, %v924_v36  ;;  %v925_v55 = vadd.f32 %v911_v34, %v894_v38  ;;  %v1311_v44 = vpop.f32.mrb[51].mxu1 }
 0x304   :  { %952 = vst [vmem:[#allocation2 + $0xd0] sm:$0xff] %v938_v39  ;;  %v939_v45 = vadd.f32 %v1815_v16, %v925_v55 }
 0x306   :  { %953 = vst [vmem:[#allocation2 + $0xd8] sm:$0xff] %v939_v45 }
 0x307   :  { %1360 = shalt.err (!%p1357_p4)
}
 0x308   :  { %s1361_s26 = scalar_lea.hbm %s1955_s4, 3584 }
 0x309   :  { %p1362_p5 = scmp.ne.s32.totalorder %s1955_s4, %s1361_s26  ;;  %p1365_p6 = scmp.lt.u32.totalorder %s1361_s26, %s1955_s4 }
 0x30b   :  { %p1367_p7 = pnand %p1365_p6, %p1362_p5 }
 0x30d   :  { %1370 = shalt.err (!%p1367_p7)
}
 0x30e   :  { %s1376_s5 = smov 128   ;;  %s1377_s6 = smov 8  }
 0x30f   :  { %965 = dma.vmem_to_hbm [thread:$0]  %s960_s22, 3584, %s1955_s4, [#allocation3], %s1376_s5, %s1376_s5, %s1377_s6  }
 0x310   :  { %1371 = dma.done.wait [#allocation3], 3584  }
 0x311   :  { %1372 = vsyncadd [#allocation3], 4294963712 }
 0x312   :  { %969 = vsyncpa [#allocation3], 1 }

</bundles_post_ra>
